<compile_context>
chip_gen: v7x
topology: tpu7x:2x2x1
jax: 0.10.0
libtpu: 0.0.40
codegen_flags: <defaults>
</compile_context>

<pallas_src>
import math

import jax
import jax.numpy as jnp
from jax.experimental import pallas as pl
from jax.experimental.pallas import tpu as pltpu


def _normalize_kernel(x_ref, mean_ref, std_ref, o_ref):
    # forward: (x - mean) / clamp(std, min=1e-6)
    # Reciprocal hoisted to the (1, W) row -> TB-times less transcendental /
    # divide work than a broadcast divide over the whole (TB, W) tile.
    inv_std = 1.0 / jnp.maximum(std_ref[...], jnp.float32(1e-6))
    o_ref[...] = (x_ref[...] - mean_ref[...]) * inv_std


def _denormalize_kernel(x_ref, mean_ref, std_ref, o_ref):
    # inverse: x * std + mean  (un-clamped std, as in the PyTorch module)
    o_ref[...] = x_ref[...] * std_ref[...] + mean_ref[...]


def _round_up(n, m):
    return ((n + m - 1) // m) * m


def _lane_group(dim):
    # Smallest G such that G * dim is a multiple of 128 lanes.
    return 128 // math.gcd(dim, 128)


def _pick_block_rows(rows, width, target_rows=512, max_block_bytes=4 << 20):
    # Keep each (TB, width) f32 block <= max_block_bytes so that the
    # double-buffered x + out blocks (4 buffers) stay well under the v7x
    # 32 MiB scoped-VMEM default while remaining above the ~512-row knee
    # where the HBM roofline is already ~85% saturated.
    cap = max(8, ((max_block_bytes // (4 * width)) // 8) * 8)
    tb = min(target_rows, cap, _round_up(rows, 8))
    return max(tb, 8)


def normalizer_forward(x, mean, std, *, inverse=False, block_rows=512):
    """Pallas equivalent of Normalizer.forward.

    x:    (batch, dim) float
    mean: (dim,)       float
    std:  (dim,)       float
    """
    batch, dim = x.shape
    orig_dtype = x.dtype
    x = x.astype(jnp.float32)
    mean = mean.astype(jnp.float32)
    std = std.astype(jnp.float32)

    # --- lane packing: (batch, dim) -> (rows, G*dim), G*dim % 128 == 0 ------
    g = _lane_group(dim)
    width = g * dim
    batch_pad = _round_up(batch, g)
    if batch_pad != batch:
        x = jnp.pad(x, ((0, batch_pad - batch), (0, 0)))
    rows = batch_pad // g
    x_packed = x.reshape(rows, width)
    mean_row = jnp.tile(mean, g).reshape(1, width)
    std_row = jnp.tile(std, g).reshape(1, width)

    # --- batch (row) tiling -------------------------------------------------
    tb = _pick_block_rows(rows, width, target_rows=block_rows)
    rows_pad = _round_up(rows, tb)
    if rows_pad != rows:
        x_packed = jnp.pad(x_packed, ((0, rows_pad - rows), (0, 0)))
    grid = (rows_pad // tb,)

    kernel = _denormalize_kernel if inverse else _normalize_kernel

    out_packed = pl.pallas_call(
        kernel,
        out_shape=jax.ShapeDtypeStruct((rows_pad, width), jnp.float32),
        grid=grid,
        in_specs=[
            pl.BlockSpec((tb, width), lambda i: (i, 0)),
            pl.BlockSpec((1, width), lambda i: (0, 0)),   # VMEM-resident
            pl.BlockSpec((1, width), lambda i: (0, 0)),   # VMEM-resident
        ],
        out_specs=pl.BlockSpec((tb, width), lambda i: (i, 0)),
        compiler_params=pltpu.CompilerParams(
            dimension_semantics=("parallel",),
        ),
    )(x_packed, mean_row, std_row)

    out = out_packed[:rows].reshape(batch_pad, dim)[:batch]
    return out.astype(orig_dtype)


if __name__ == "__main__":
    key = jax.random.PRNGKey(0)
    k_x, k_m, k_s = jax.random.split(key, 3)

    batch, dim = 64, 32  # small shapes consistent with a (batch, dim) normalizer

    x = jax.random.normal(k_x, (batch, dim), dtype=jnp.float32)
    # Deterministic "buffer" values (zeros/ones in __init__), perturbed so the
    # math is non-trivial.
    mean = 0.1 * jax.random.normal(k_m, (dim,), dtype=jnp.float32)
    std = 1.0 + 0.05 * jnp.abs(jax.random.normal(k_s, (dim,), dtype=jnp.float32))

    # forward (normalize)
    y = normalizer_forward(x, mean, std, inverse=False)
    # forward with inverse=True (denormalize)
    z = normalizer_forward(y, mean, std, inverse=True)
    jax.block_until_ready((y, z))

    # reference check in plain JAX
    y_ref = (x - mean[None, :]) / jnp.maximum(std[None, :], 1e-6)
    z_ref = y_ref * std[None, :] + mean[None, :]
    assert jnp.allclose(y, y_ref, atol=1e-5, rtol=1e-5), "forward mismatch"
    assert jnp.allclose(z, z_ref, atol=1e-5, rtol=1e-5), "inverse mismatch"

    # TODO(synk): update()/fit() are stateful running-stat buffer updates
    # (training-time, not part of the forward hot path); they are not
    # implemented as Pallas kernels.

    print("KERNEL_OK")
</pallas_src>

<mosaic_0001>
module attributes {stable_mosaic.version = 11 : i64} {
  func.func @_normalize_kernel(%arg0: i32, %arg1: memref<16x128xf32, #tpu.memory_space<vmem>>, %arg2: memref<1x128xf32, #tpu.memory_space<vmem>>, %arg3: memref<1x128xf32, #tpu.memory_space<vmem>>, %arg4: memref<16x128xf32, #tpu.memory_space<vmem>>) attributes {dimension_semantics = [#tpu.dimension_semantics<parallel>], iteration_bounds = array<i64: 1>, scalar_prefetch = 0 : i64, scratch_operands = 0 : i64, tpu.core_type = #tpu.core_type<tc>, window_params = [{transform_indices = @transform_0, window_bounds = array<i64: 16, 128>}, {pipeline_mode = #tpu.pipeline_mode<synchronous>, transform_indices = @transform_1, window_bounds = array<i64: 1, 128>}, {pipeline_mode = #tpu.pipeline_mode<synchronous>, transform_indices = @transform_2, window_bounds = array<i64: 1, 128>}, {transform_indices = @transform_3, window_bounds = array<i64: 16, 128>}]} {
    %c0 = arith.constant 0 : index
    %c0_0 = arith.constant 0 : index
    %0 = vector.load %arg3[%c0, %c0_0] : memref<1x128xf32, #tpu.memory_space<vmem>>, vector<1x128xf32>
    %cst = arith.constant 9.99999997E-7 : f32
    %1 = vector.broadcast %cst : f32 to vector<1x128xf32>
    %2 = arith.maximumf %0, %1 : vector<1x128xf32>
    %cst_1 = arith.constant 1.000000e+00 : f32
    %3 = vector.broadcast %cst_1 : f32 to vector<1x128xf32>
    %4 = arith.divf %3, %2 : vector<1x128xf32>
    %c0_2 = arith.constant 0 : index
    %c0_3 = arith.constant 0 : index
    %5 = vector.load %arg1[%c0_2, %c0_3] : memref<16x128xf32, #tpu.memory_space<vmem>>, vector<16x128xf32>
    %c0_4 = arith.constant 0 : index
    %c0_5 = arith.constant 0 : index
    %6 = vector.load %arg2[%c0_4, %c0_5] : memref<1x128xf32, #tpu.memory_space<vmem>>, vector<1x128xf32>
    %7 = vector.broadcast %6 : vector<1x128xf32> to vector<16x128xf32>
    %8 = arith.subf %5, %7 : vector<16x128xf32>
    %9 = vector.broadcast %4 : vector<1x128xf32> to vector<16x128xf32>
    %10 = arith.mulf %8, %9 : vector<16x128xf32>
    %c0_6 = arith.constant 0 : index
    %c0_7 = arith.constant 0 : index
    %11 = vector.load %arg4[%c0_6, %c0_7] : memref<16x128xf32, #tpu.memory_space<vmem>>, vector<16x128xf32>
    tpu.vector_store %arg4[%c0_6, %c0_7], %10 {strides = array<i32>} : memref<16x128xf32, #tpu.memory_space<vmem>>, vector<16x128xf32>,
    return
  }
  func.func @transform_0(%arg0: i32) -> (i32, i32) {
    %c0_i32 = arith.constant 0 : i32
    %c0_i32_0 = arith.constant 0 : i32
    return %arg0, %c0_i32 : i32, i32
  }
  func.func @transform_1(%arg0: i32) -> (i32, i32) {
    %c0_i32 = arith.constant 0 : i32
    %c0_i32_0 = arith.constant 0 : i32
    %c0_i32_1 = arith.constant 0 : i32
    return %c0_i32, %c0_i32_0 : i32, i32
  }
  func.func @transform_2(%arg0: i32) -> (i32, i32) {
    %c0_i32 = arith.constant 0 : i32
    %c0_i32_0 = arith.constant 0 : i32
    %c0_i32_1 = arith.constant 0 : i32
    return %c0_i32, %c0_i32_0 : i32, i32
  }
  func.func @transform_3(%arg0: i32) -> (i32, i32) {
    %c0_i32 = arith.constant 0 : i32
    %c0_i32_0 = arith.constant 0 : i32
    return %arg0, %c0_i32 : i32, i32
  }
}

</mosaic_0001>

<bundles_post_ra>
// kernel: tpu_custom_call.1
= control target key start
LH: loop header
LB: loop body
LE: loop exit
PB: predicated region body
PF: predicated region fallthrough
CT: control target
= control target key end

     0   :  { %8 = vsyncpa [#allocation3], 0  ;;  %s186_s0 = inlined_call_operand.hbm [shape: f32[16,128], index: 0, kind: input, shape index: {}]   ;;  %s187_s1 = inlined_call_operand.vmem [shape: f32[1,128], index: 1, kind: input, shape index: {}]   ;;  %s188_s2 = inlined_call_operand.vmem [shape: f32[1,128], index: 2, kind: input, shape index: {}]   ;;  %s189_s3 = inlined_call_operand.hbm [shape: f32[16,128], index: 3, kind: output, shape index: {}]  }
   0x1   :  { %9 = vsyncpa [#allocation4], 0  ;;  %s126_s12 = smov [#allocation2]   ;;  %s78_s16 = scalar_lea.hbm %s186_s0, 256 }
   0x2   :  { %s15_s13 = sshll.u32 %s126_s12, 4  ;;  %p79_p0 = scmp.ne.s32.totalorder %s186_s0, %s78_s16  ;;  %s16_s13 = int_to_ptr.vmem [resolvable:$true] %s15_s13 }
   0x3   :  { %p82_p1 = scmp.lt.u32.totalorder %s78_s16, %s186_s0 }
   0x5   :  { %p84_p2 = pnand %p82_p1, %p79_p0 }
   0x7   :  { %87 = shalt.err (!%p84_p2)
}
   0x8   :  { %s88_s21 = scalar_lea.vmem %s16_s13, 256  ;;  %p93_p4 = scmp.lt.s32.totalorder %s16_s13, %s16_s13 }
   0x9   :  { %p89_p3 = scmp.ne.s32.totalorder %s16_s13, %s88_s21  ;;  %p94_p5 = scmp.lt.s32.totalorder %s88_s21, %s88_s21 }
   0xb   :  { %p95_p6 = por %p94_p5, %p93_p4 }
   0xd   :  { %p96_p7 = pnand %p95_p6, %p89_p3 }
   0xf   :  { %99 = shalt.err (!%p96_p7)
}
  0x10   :  { %s127_s22 = smov 128   ;;  %s128_s23 = smov 8  }
  0x11   :  { %21 = dma.hbm_to_vmem [thread:$0]  %s186_s0, 256, %s16_s13, [#allocation3], %s127_s22, %s127_s22, %s128_s23  }
  0x12   :  { %122 = dma.done.wait [#allocation3], 256  }
  0x13   :  { %123 = vsyncadd [#allocation3], 4294967040  ;;  %v29_v0 = vld [vmem:[%s188_s2] sm:$0x1]  ;;  %v45_v2 = vlaneseq  ;;  %v34_v6 = vld [vmem:[#allocation2 + $0x8] sm:$0xff]  ;;  %s129_s0 = smov [#allocation5]  }
  0x14   :  { %v30_v1 = vmax.f32 %v29_v0, 1e-06  ;;  %v33_v4 = vld [vmem:[#allocation2] sm:$0xff]  ;;  %s59_s30 = sshll.u32 %s129_s0, 4  ;;  %s60_s30 = int_to_ptr.vmem [resolvable:$true] %s59_s30 }
  0x15   :  { %v46_v3 = vshrl.u32 %v45_v2, 7  ;;  %v71_v5 = vld [vmem:[%s187_s1] ss:$0 sm:$0xff]  ;;  %s100_s2 = scalar_lea.vmem %s60_s30, 256  ;;  %p105_p9 = scmp.lt.s32.totalorder %s60_s30, %s60_s30 }
  0x16   :  { %76 = vrcp.f32 %v30_v1  ;;  %v42_v8 = vsub.f32 %v33_v4, %v71_v5  ;;  %v43_v9 = vsub.f32 %v34_v6, %v71_v5  ;;  %p101_p8 = scmp.ne.s32.totalorder %s60_s30, %s100_s2  ;;  %p106_p10 = scmp.lt.s32.totalorder %s100_s2, %s100_s2 }
  0x17   :  { %v47_v7 = vsub.s32 0, %v46_v3 }
  0x18   :  { %p107_p11 = por %p106_p10, %p105_p9 }
  0x1a   :  { %p108_p12 = pnand %p107_p11, %p101_p8 }
  0x20   :  { %v77_v10 = vpop.eup %76 }
  0x21   :  { %v48_v11 = vrot.slane %v77_v10, %v47_v7 }
  0x23   :  { %v50_v12 = vmul.f32 %v48_v11, %v42_v8  ;;  %v51_v13 = vmul.f32 %v48_v11, %v43_v9 }
  0x25   :  { %52 = vst [vmem:[#allocation5] sm:$0xff] %v50_v12  ;;  %53 = vst [vmem:[#allocation5 + $0x8] sm:$0xff] %v51_v13 }
  0x26   :  { %111 = shalt.err (!%p108_p12)
}
  0x27   :  { %s112_s5 = scalar_lea.hbm %s189_s3, 256 }
  0x28   :  { %p113_p13 = scmp.ne.s32.totalorder %s189_s3, %s112_s5  ;;  %p116_p0 = scmp.lt.u32.totalorder %s112_s5, %s189_s3 }
  0x2a   :  { %p118_p1 = pnand %p116_p0, %p113_p13 }
  0x2c   :  { %121 = shalt.err (!%p118_p1)
}
  0x2d   :  { %65 = dma.vmem_to_hbm [thread:$0]  %s60_s30, 256, %s189_s3, [#allocation4], %s127_s22, %s127_s22, %s128_s23  }
  0x2e   :  { %124 = dma.done.wait [#allocation4], 256  }
  0x2f   :  { %125 = vsyncadd [#allocation4], 4294967040 }
  0x30   :  { %69 = vsyncpa [#allocation3], 1 }
  0x31   :  { %70 = vsyncpa [#allocation4], 1 }

</bundles_post_ra>
